<compile_context>
chip_gen: v6e
topology: v6e:2x2x1
jax: 0.10.0
libtpu: 0.0.40
codegen_flags: <defaults>
</compile_context>

<pallas_src>
import math

import numpy as np

import jax
import jax.numpy as jnp
from jax.experimental import pallas as pl
from jax.experimental.pallas import tpu as pltpu


# ---------------------------------------------------------------------------
# Helpers
# ---------------------------------------------------------------------------
def _ceil_to(x, m):
    return ((x + m - 1) // m) * m


def _pick_tile(n, target, min_blocks=1):
    """Largest multiple-of-128 divisor of n that is <= target and leaves at
    least `min_blocks` blocks.  n must be a multiple of 128."""
    best = 128
    t = 128
    while t <= min(target, n):
        if n % t == 0 and (n // t) >= min_blocks:
            best = t
        t += 128
    return best


def _clamp_vmem(nbytes):
    # Leave headroom; stay under v7x's 64 MiB physical VMEM.
    return int(min(48 << 20, max(32 << 20, nbytes + (8 << 20))))


# ---------------------------------------------------------------------------
# Wrapper
# ---------------------------------------------------------------------------
def gcn_forward(x, adj, weight, bias):
    N, nfeat = x.shape
    nhid = weight.shape[1]
    assert adj.shape == (N, N)

    # Lane-aligned padding (128 granularity, not tile granularity).
    n_pad = _ceil_to(N, 128)
    nfeat_pad = _ceil_to(nfeat, 128)
    nhid_pad = _ceil_to(nhid, 128)

    # Tiles: tile_m kept small enough for >=2 row blocks (v7x dual-TC),
    # tile_k sized for long DMA runs but fine-grained enough for sparsity.
    tile_m = _pick_tile(n_pad, target=512, min_blocks=2)
    tile_k = _pick_tile(n_pad, target=max(128, min(2048, n_pad // 8)))
    tile_f = _pick_tile(nfeat_pad, target=2048)

    n_rb = n_pad // tile_m
    n_kb = n_pad // tile_k

    # ------------------------------------------------------------------
    # Operand preparation (avoid materializing copies when not needed).
    # ------------------------------------------------------------------
    if adj.dtype == jnp.bfloat16 and adj.shape == (n_pad, n_pad):
        adjb = adj  # zero-copy path
    else:
        adjb = jnp.zeros((n_pad, n_pad), jnp.bfloat16).at[:N, :N].set(
            adj.astype(jnp.bfloat16))

    if x.dtype == jnp.bfloat16 and x.shape == (n_pad, nfeat_pad):
        xb = x
    else:
        xb = jnp.zeros((n_pad, nfeat_pad), jnp.bfloat16).at[:N, :nfeat].set(
            x.astype(jnp.bfloat16))

    wb = jnp.zeros((nfeat_pad, nhid_pad), jnp.bfloat16).at[:nfeat, :nhid].set(
        weight.astype(jnp.bfloat16))
    b2d = jnp.zeros((1, nhid_pad), jnp.float32).at[0, :nhid].set(
        bias.astype(jnp.float32))

    # ------------------------------------------------------------------
    # Block-sparsity metadata: which (row-block, k-tile) adj tiles are nonzero.
    # ------------------------------------------------------------------
    tile_mask = jnp.any(
        adjb.reshape(n_rb, tile_m, n_kb, tile_k) != 0, axis=(1, 3))
    mask_np = np.asarray(jax.device_get(tile_mask))
    nnz_np = mask_np.sum(axis=1).astype(np.int32)
    max_nnz = max(1, int(nnz_np.max()))

    kid_np = np.zeros((n_rb, max_nnz), dtype=np.int32)
    for i in range(n_rb):
        idx = np.flatnonzero(mask_np[i])
        if idx.size:
            kid_np[i, :idx.size] = idx
            # Repeat last valid index for padding steps -> consecutive equal
            # block index -> pipeline skips the redundant DMA.
            kid_np[i, idx.size:] = idx[-1]
    nnz = jnp.asarray(nnz_np)                       # (n_rb,)  int32 -> SMEM
    kid_flat = jnp.asarray(kid_np.reshape(-1))      # (n_rb*max_nnz,) int32 -> SMEM

    # ------------------------------------------------------------------
    # Pass 1: support = x @ W   (bf16 in, f32 accumulate, bf16 out)
    # ------------------------------------------------------------------
    def support_kernel(x_ref, w_ref, s_ref, acc_ref):
        f = pl.program_id(1)

        @pl.when(f == 0)
        def _():
            acc_ref[...] = jnp.zeros_like(acc_ref)

        acc_ref[...] += jnp.dot(x_ref[...], w_ref[...],
                                preferred_element_type=jnp.float32)

        @pl.when(f == pl.num_programs(1) - 1)
        def _():
            s_ref[...] = acc_ref[...].astype(s_ref.dtype)

    pass1_vmem = (tile_m * tile_f * 2 * 2 + tile_f * nhid_pad * 2 * 2
                  + tile_m * nhid_pad * 2 * 2 + tile_m * nhid_pad * 4)
    support = pl.pallas_call(
        support_kernel,
        out_shape=jax.ShapeDtypeStruct((n_pad, nhid_pad), jnp.bfloat16),
        grid=(n_rb if n_pad // tile_m == n_rb else n_pad // tile_m,
              nfeat_pad // tile_f),
        in_specs=[
            pl.BlockSpec((tile_m, tile_f), lambda i, f: (i, f)),
            pl.BlockSpec((tile_f, nhid_pad), lambda i, f: (f, 0)),
        ],
        out_specs=pl.BlockSpec((tile_m, nhid_pad), lambda i, f: (i, 0)),
        scratch_shapes=[pltpu.VMEM((tile_m, nhid_pad), jnp.float32)],
        compiler_params=pltpu.CompilerParams(
            dimension_semantics=("parallel", "arbitrary"),
            vmem_limit_bytes=_clamp_vmem(pass1_vmem),
        ),
    )(xb, wb)

    # ------------------------------------------------------------------
    # Pass 2: out = relu(adj @ support + b), block-sparse over (row, nnz-k).
    # ------------------------------------------------------------------
    sup_bytes = n_pad * nhid_pad * 2
    resident = sup_bytes <= (12 << 20)   # keep 2x buffered support v7x-safe

    def aggregate_kernel(nnz_ref, kid_ref, adj_ref, s_ref, b_ref, o_ref):
        i = pl.program_id(0)
        k = pl.program_id(1)

        @pl.when(k == 0)
        def _init():
            o_ref[...] = jnp.zeros_like(o_ref)

        @pl.when(k < nnz_ref[i])
        def _acc():
            if resident:
                kid = kid_ref[i * max_nnz + k]
                off = pl.multiple_of(kid * tile_k, tile_k)
                s_blk = s_ref[pl.ds(off, tile_k), :]
            else:
                s_blk = s_ref[...]
            o_ref[...] += jnp.dot(adj_ref[...], s_blk,
                                  preferred_element_type=jnp.float32)

        @pl.when(k == pl.num_programs(1) - 1)
        def _fin():
            o_ref[...] = jnp.maximum(o_ref[...] + b_ref[...], 0.0)

    adj_spec = pl.BlockSpec(
        (tile_m, tile_k), lambda i, k, nnz, kid: (i, kid[i * max_nnz + k]))
    if resident:
        support_spec = pl.BlockSpec(
            (n_pad, nhid_pad), lambda i, k, nnz, kid: (0, 0))
    else:
        support_spec = pl.BlockSpec(
            (tile_k, nhid_pad), lambda i, k, nnz, kid: (kid[i * max_nnz + k], 0))
    bias_spec = pl.BlockSpec((1, nhid_pad), lambda i, k, nnz, kid: (0, 0))
    out_spec = pl.BlockSpec((tile_m, nhid_pad), lambda i, k, nnz, kid: (i, 0))

    pass2_vmem = (tile_m * tile_k * 2 * 2
                  + (sup_bytes * 2 if resident else tile_k * nhid_pad * 2 * 2)
                  + tile_m * nhid_pad * 4 * 2
                  + nhid_pad * 4 * 2)
    out = pl.pallas_call(
        aggregate_kernel,
        out_shape=jax.ShapeDtypeStruct((n_pad, nhid_pad), jnp.float32),
        grid_spec=pltpu.PrefetchScalarGridSpec(
            num_scalar_prefetch=2,
            grid=(n_rb, max_nnz),
            in_specs=[adj_spec, support_spec, bias_spec],
            out_specs=out_spec,
        ),
        compiler_params=pltpu.CompilerParams(
            dimension_semantics=("parallel", "arbitrary"),
            vmem_limit_bytes=_clamp_vmem(pass2_vmem),
        ),
    )(nnz, kid_flat, adjb, support, b2d)

    return out[:N, :nhid]


# ---------------------------------------------------------------------------
# References
# ---------------------------------------------------------------------------
def gcn_reference_bf16(x, adj, weight, bias):
    # Same numerics as the kernel (bf16 operands, f32 accumulation).
    xb = x.astype(jnp.bfloat16)
    ab = adj.astype(jnp.bfloat16)
    wb = weight.astype(jnp.bfloat16)
    s = jnp.dot(xb, wb, preferred_element_type=jnp.float32).astype(jnp.bfloat16)
    out = jnp.dot(ab, s, preferred_element_type=jnp.float32) + bias[None, :]
    return jnp.maximum(out, 0.0)


def gcn_reference_f32(x, adj, weight, bias):
    return jnp.maximum(adj.astype(jnp.float32) @ (x @ weight) + bias[None, :], 0.0)


if __name__ == "__main__":
    # Small shapes consistent with GCN(nfeat, nhid): N nodes, nfeat in, nhid out.
    # N chosen so that the row grid has 2 blocks and the banded adjacency has
    # genuinely empty (row-block, k-tile) tiles, exercising the sparse skip.
    N, nfeat, nhid = 512, 64, 32

    key = jax.random.PRNGKey(0)
    kx, kw, kb = jax.random.split(key, 3)

    # Deterministic parameter init matching GraphConvolution.reset_parameters():
    # uniform(-stdv, stdv), stdv = 1/sqrt(nhid).
    stdv = 1.0 / math.sqrt(nhid)
    weight = jax.random.uniform(kw, (nfeat, nhid), jnp.float32, -stdv, stdv)
    bias = jax.random.uniform(kb, (nhid,), jnp.float32, -stdv, stdv)

    # Node features and a row-normalized banded adjacency (self-loops included).
    x = jax.random.normal(kx, (N, nfeat), jnp.float32)
    idx = jnp.arange(N)
    band = (jnp.abs(idx[:, None] - idx[None, :]) <= 48).astype(jnp.float32)
    adj_f32 = band / jnp.sum(band, axis=1, keepdims=True)
    adj = adj_f32.astype(jnp.bfloat16)   # caller-side bf16 -> zero-copy in wrapper

    y = gcn_forward(x, adj, weight, bias)
    y = jax.block_until_ready(y)

    assert y.shape == (N, nhid)
    # Tight check against a bf16-consistent reference.
    y_ref_bf16 = gcn_reference_bf16(x, adj, weight, bias)
    assert jnp.allclose(y, y_ref_bf16, atol=2e-3, rtol=2e-3)
    # Loose sanity check against full-f32 math (bf16 input rounding only).
    y_ref_f32 = gcn_reference_f32(x, adj_f32, weight, bias)
    assert jnp.allclose(y, y_ref_f32, atol=5e-2, rtol=5e-2)

    print("KERNEL_OK")
</pallas_src>

<mosaic_0001>
module attributes {stable_mosaic.version = 11 : i64} {
  func.func @support_kernel(%arg0: i32, %arg1: i32, %arg2: memref<256x128xbf16, #tpu.memory_space<vmem>>, %arg3: memref<128x128xbf16, #tpu.memory_space<vmem>>, %arg4: memref<256x128xbf16, #tpu.memory_space<vmem>>, %arg5: memref<256x128xf32, #tpu.memory_space<vmem>>) attributes {dimension_semantics = [#tpu.dimension_semantics<parallel>, #tpu.dimension_semantics<arbitrary>], iteration_bounds = array<i64: 2, 1>, scalar_prefetch = 0 : i64, scratch_operands = 1 : i64, tpu.core_type = #tpu.core_type<tc>, window_params = [{transform_indices = @transform_0, window_bounds = array<i64: 256, 128>}, {transform_indices = @transform_1, window_bounds = array<i64: 128, 128>}, {transform_indices = @transform_2, window_bounds = array<i64: 256, 128>}]} {
    %c0_i32 = arith.constant 0 : i32
    %0 = arith.cmpi eq, %arg1, %c0_i32 : i32
    %1 = arith.extui %0 : i1 to i32
    %c0_i32_0 = arith.constant 0 : i32
    %2 = arith.cmpi ne, %1, %c0_i32_0 : i32
    scf.if %2 {
      %cst_10 = arith.constant 0.000000e+00 : f32
      %12 = vector.broadcast %cst_10 : f32 to vector<256x128xf32>
      %c0_11 = arith.constant 0 : index
      %c0_12 = arith.constant 0 : index
      %13 = vector.load %arg5[%c0_11, %c0_12] : memref<256x128xf32, #tpu.memory_space<vmem>>, vector<256x128xf32>
      tpu.vector_store %arg5[%c0_11, %c0_12], %12 {strides = array<i32>} : memref<256x128xf32, #tpu.memory_space<vmem>>, vector<256x128xf32>,
    } else {
    }
    %c0 = arith.constant 0 : index
    %c0_1 = arith.constant 0 : index
    %3 = vector.load %arg5[%c0, %c0_1] : memref<256x128xf32, #tpu.memory_space<vmem>>, vector<256x128xf32>
    %c0_2 = arith.constant 0 : index
    %c0_3 = arith.constant 0 : index
    %4 = vector.load %arg2[%c0_2, %c0_3] : memref<256x128xbf16, #tpu.memory_space<vmem>>, vector<256x128xbf16>
    %c0_4 = arith.constant 0 : index
    %c0_5 = arith.constant 0 : index
    %5 = vector.load %arg3[%c0_4, %c0_5] : memref<128x128xbf16, #tpu.memory_space<vmem>>, vector<128x128xbf16>
    %cst = arith.constant dense<0.000000e+00> : vector<256x128xf32>
    %6 = tpu.matmul %4, %5, %cst {dimension_numbers = #tpu.dot_dimension_numbers<[1], [0], [0], [1], [0, 0, 1, 1], [], []>} : vector<256x128xbf16>, vector<128x128xbf16>, vector<256x128xf32> -> vector<256x128xf32>
    %7 = arith.addf %3, %6 : vector<256x128xf32>
    %c0_6 = arith.constant 0 : index
    %c0_7 = arith.constant 0 : index
    %8 = vector.load %arg5[%c0_6, %c0_7] : memref<256x128xf32, #tpu.memory_space<vmem>>, vector<256x128xf32>
    tpu.vector_store %arg5[%c0_6, %c0_7], %7 {strides = array<i32>} : memref<256x128xf32, #tpu.memory_space<vmem>>, vector<256x128xf32>,
    %c0_i32_8 = arith.constant 0 : i32
    %9 = arith.cmpi eq, %arg1, %c0_i32_8 : i32
    %10 = arith.extui %9 : i1 to i32
    %c0_i32_9 = arith.constant 0 : i32
    %11 = arith.cmpi ne, %10, %c0_i32_9 : i32
    scf.if %11 {
      %c0_10 = arith.constant 0 : index
      %c0_11 = arith.constant 0 : index
      %12 = vector.load %arg5[%c0_10, %c0_11] : memref<256x128xf32, #tpu.memory_space<vmem>>, vector<256x128xf32>
      %13 = arith.truncf %12 : vector<256x128xf32> to vector<256x128xbf16>
      %c0_12 = arith.constant 0 : index
      %c0_13 = arith.constant 0 : index
      %14 = vector.load %arg4[%c0_12, %c0_13] : memref<256x128xbf16, #tpu.memory_space<vmem>>, vector<256x128xbf16>
      tpu.vector_store %arg4[%c0_12, %c0_13], %13 {strides = array<i32>} : memref<256x128xbf16, #tpu.memory_space<vmem>>, vector<256x128xbf16>,
    } else {
    }
    return
  }
  func.func @transform_0(%arg0: i32, %arg1: i32) -> (i32, i32) {
    %c0_i32 = arith.constant 0 : i32
    return %arg0, %arg1 : i32, i32
  }
  func.func @transform_1(%arg0: i32, %arg1: i32) -> (i32, i32) {
    %c0_i32 = arith.constant 0 : i32
    %c0_i32_0 = arith.constant 0 : i32
    return %arg1, %c0_i32 : i32, i32
  }
  func.func @transform_2(%arg0: i32, %arg1: i32) -> (i32, i32) {
    %c0_i32 = arith.constant 0 : i32
    %c0_i32_0 = arith.constant 0 : i32
    return %arg0, %c0_i32 : i32, i32
  }
}

</mosaic_0001>

<bundles_post_ra>
// kernel: tpu_custom_call.1
= control target key start
LH: loop header
LB: loop body
LE: loop exit
PB: predicated region body
PF: predicated region fallthrough
CT: control target
= control target key end

     0   :  { %7 = vsyncpa [#allocation4], 0  ;;  %s1774_s0 = inlined_call_operand.hbm [shape: bf16[512,128], index: 0, kind: input, shape index: {}]   ;;  %s1775_s1 = inlined_call_operand.hbm [shape: bf16[128,128], index: 1, kind: input, shape index: {}]   ;;  %s1776_s2 = inlined_call_operand.hbm [shape: bf16[512,128], index: 2, kind: output, shape index: {}]  }
   0x1   :  { %9 = vsyncpa [#allocation4 + $0x1], 0 }
   0x2   :  { %10 = vsyncpa [#allocation7], 0 }
   0x3   :  { %11 = vsyncpa [#allocation5], 0 }
   0x4   :  { %13 = vsyncpa [#allocation5 + $0x1], 0  ;;  %s1546_s9 = smov 0   ;;  %s1548_s10 = smov 0  }
   0x5   :  { %s1550_s11 = smov 0   ;;  %s1552_s12 = smov 0  }
   0x6   :  { %s1554_s13 = smov 0   ;;  %s1556_s14 = smov 0  }
   0x7 LB: > { %s993_s15 = sadd.s32 4294967295, %s1522_s14   ;;  %s994_s16 = sadd.s32 4294967294, %s1522_s14   ;;  %s1522_s14 = sphi %s1556_s14, %s19_s14   ;;  %s1518_s13 = sphi %s1554_s13, %s1796_s13   ;;  %s1514_s12 = sphi %s1552_s12, %s1795_s12   ;;  %s1510_s11 = sphi %s1550_s11, %s1794_s11   ;;  %s1506_s10 = sphi %s1548_s10, %s1793_s10   ;;  %s1502_s9 = sphi %s1546_s9, %s1792_s9  }
   0x8   : > { %p53_p0 = scmp.ne.s32.totalorder %s1506_s10, %s1502_s9  ;;  %p1580_p1 = scmp.eq.s32.totalorder %s993_s15, 0 }
   0x9   : > { %p1584_p2 = scmp.eq.s32.totalorder %s993_s15, 1  ;;  %p109_p3 = scmp.eq.s32.totalorder %s994_s16, 1 }
   0xa   : > { %p1590_p4 = por %p1580_p1, %p53_p0  ;;  %p995_p5 = scmp.ge.s32.totalorder %s1522_s14, 1 }
   0xb   : > { %p1595_p6 = por %p109_p3, %p53_p0  ;;  %p116_p7 = scmp.lt.s32.totalorder %s1522_s14, 3 }
   0xc   : > { %s1781_s19 = scalar_select %p1590_p4, 1, 0 }
   0xd   : > { %s1782_s20 = scalar_select %p1595_p6, 1, 0 }
   0xe   : > { %p1600_p8 = pnand %p995_p5, %p116_p7  ;;  %s1524_s22 = smov [#allocation6]  }
   0xf   : > { %s131_s23 = sshll.u32 %s1524_s22, 4  ;;  %s31_s25 = sadd.s32 1, %s1518_s13  ;;  %s132_s23 = int_to_ptr.vmem [resolvable:$true] %s131_s23 }
  0x10   : > { %p1291_p9 = pneg %p1600_p8  ;;  %s1395_s26 = scalar_lea.vmem %s132_s23, 1024 }
  0x11   : > { %p1396_p13 = scmp.ne.s32.totalorder %s132_s23, %s1395_s26  ;;  %p1403_p5 = scmp.lt.s32.totalorder %s132_s23, %s132_s23 }
  0x12   : > { %p1609_p11 = pnand %p1291_p9, %p1580_p1  ;;  %p1404_p7 = scmp.lt.s32.totalorder %s1395_s26, %s1395_s26 }
  0x14   : > { %p1386_p12 = pneg %p1609_p11  ;;  %p1405_p6 = por %p1404_p7, %p1403_p5 }
  0x16   : > { %p1398_p0 = pnand %p1396_p13, %p1386_p12 }
  0x18   : > { %p1399_p3 = pneg %p1398_p0 }
  0x1a   : > { %p1406_p4 = pnand %p1405_p6, %p1399_p3 }
  0x1c   : > { %1409 = shalt.err (!%p1406_p4)
}
  0x1d   : > { %s1778_s27 = smov 64   ;;  %s1526_s28 = smov 4  }
  0x1e   : > { %1294 = dma.hbm_to_vmem [thread:$0]  (!%p1609_p11), %s1775_s1, 1024, %s132_s23, [#allocation7], %s1778_s27, %s1778_s27, %s1526_s28  }
  0x1f   : > { %p33_p4 = scmp.ge.s32.totalorder %s31_s25, 2  ;;  %s40_s3 = sadd.s32 1, %s1510_s11 }
  0x20   : > { %p47_p6 = scmp.ne.s32.totalorder %s1510_s11, %s1506_s10  ;;  %p48_p9 = scmp.eq.s32.totalorder %s1522_s14, 0 }
  0x21   : > { %s1798_s25 = smov (%p33_p4, %s31_s25), 0  ;;  %p1304_p0 = scmp.lt.s32.totalorder %s1522_s14, 2 }
  0x22   : > { %p1630_p12 = por %p48_p9, %p47_p6  ;;  %p1636_p13 = por %p1584_p2, %p47_p6 }
  0x23   : > { %s35_s6 = ssub.s32 %s1518_s13, %s1798_s25  ;;  %s145_s7 = sand.u32 1, %s1510_s11  }
  0x24   : > { %p38_p11 = scmp.eq.s32.totalorder %s35_s6, 0  ;;  %s998_s8 = sshll.u32 %s145_s7, 7 }
  0x25   : > { %s1066_s16 = sshll.u32 %s1518_s13, 11  ;;  %s149_s26 = scalar_lea.vmem [#allocation3], %s998_s8 }
  0x26   : > { %s1645_s15 = scalar_select %p38_p11, %s1510_s11, %s40_s3  }
  0x27   : > { %s156_s24 = scalar_lea.hbm %s1774_s0, %s1066_s16  ;;  %s157_s29 = sshll.u32 %s149_s26, 4  ;;  %s158_s29 = int_to_ptr.vmem [resolvable:$true] %s157_s29 }
  0x28   : > { %p1653_p2 = pnand %p1304_p0, %p1630_p12  ;;  %s146_s30 = scalar_lea.sflag [#allocation4], %s145_s7 }
  0x29   : > { %s1423_s6 = scalar_lea.vmem %s158_s29, 2048  ;;  %s1527_s3 = smov [#allocation3]  }
  0x2a   : > { %p1412_p3 = pneg %p1653_p2  ;;  %p1424_p5 = scmp.ne.s32.totalorder %s158_s29, %s1423_s6 }
  0x2b   : > { %s1428_s27 = sshll.u32 %s1527_s3, 4  ;;  %s1429_s27 = int_to_ptr.vmem [resolvable:$false] %s1428_s27 }
  0x2c   : > { %p1426_p7 = pnand %p1424_p5, %p1412_p3  ;;  %s1430_s16 = scalar_lea.vmem %s1429_s27, 4096 }
  0x2d   : > { %p1431_p6 = scmp.lt.s32.totalorder %s158_s29, %s1429_s27  ;;  %p1432_p9 = scmp.lt.s32.totalorder %s1430_s16, %s1423_s6 }
  0x2e   : > { %p1427_p4 = pneg %p1426_p7 }
  0x2f   : > { %p1433_p11 = por %p1432_p9, %p1431_p6 }
  0x31   : > { %p1434_p10 = pnand %p1433_p11, %p1427_p4 }
  0x33   : > { %1437 = shalt.err (!%p1434_p10)
}
  0x34   : > { %s1788_s4 = smov 64   ;;  %169 = sbr.rel (%p1600_p8) target bundleno = 332 (0x14c), region = 28 }
  0x35   : > { %1298 = dma.hbm_to_vmem [thread:$0]  (!%p1653_p2), %s156_s24, 2048, %s158_s29, %s146_s30, %s1788_s4, %s1788_s4, %s1526_s28  }
  0x36   : > { %s1667_s7 = sand.u32 (!%p1600_p8), 1, %s1506_s10   ;;  %p1789_p10 = scmp.ne.s32.totalorder (!%p1600_p8), %s1781_s19, 0 }
  0x37   : > { %s1002_s27 = sshll.u32 (!%p1600_p8), %s1667_s7, 7  ;;  %s172_s8 = scalar_lea.sflag (!%p1600_p8), [#allocation4], %s1667_s7 }
  0x38   : > { %s1673_s22 = scalar_lea.vmem (!%p1600_p8), [#allocation3], %s1002_s27 }
  0x39   : > { %1489 = dma.done.wait (%p1789_p10), %s172_s8, 2048  }
  0x3a   : > { %1491 = vsyncadd (%p1789_p10), %s172_s8, 4294965248 }
  0x3b   : > { %1493 = dma.done.wait (%p1580_p1), [#allocation7], 1024  }
  0x3c   : > { %1495 = vsyncadd (%p1580_p1), [#allocation7], 4294966272  ;;  %v1360_v0 = vld [vmem:[#allocation6 + $0x38] sm:$0xff]   ;;  %v1361_v1 = vld [vmem:[#allocation6 + $0x30] sm:$0xff]   ;;  %s1701_s17 = scalar_lea.vmem [#allocation8], %s1002_s27  ;;  %s1099_s19 = sshll.u32 %s1514_s12, 11 }
  0x3d   : > { %1219 = vmatprep.subr.bf16.mxu0 %v1360_v0  ;;  %1267 = vmatprep.subr.bf16.mxu1 %v1360_v0  ;;  %v1362_v2 = vld [vmem:[#allocation6 + $0x28] sm:$0xff]   ;;  %v1363_v3 = vld [vmem:[#allocation6 + $0x20] sm:$0xff]   ;;  %v1364_v6 = vld [vmem:[#allocation6 + $0x18] sm:$0xff]   ;;  %s898_s21 = sshll.u32 %s1701_s17, 4  ;;  %s1720_s24 = scalar_lea.hbm %s1776_s2, %s1099_s19  ;;  %s1722_s21 = int_to_ptr.vmem [resolvable:$true] %s898_s21 }
  0x3e   : > { %1220 = vmatpush3.bf16.msra.mxu0 %v1360_v0  ;;  %1275 = vmatpush3.bf16.msra.mxu1 %v1360_v0  ;;  %v1368_v4 = vld [vmem:[%s1673_s22] sm:$0xff]   ;;  %v1365_v7 = vld [vmem:[#allocation6 + $0x10] sm:$0xff]   ;;  %v1366_v8 = vld [vmem:[#allocation6 + $0x8] sm:$0xff]   ;;  %s885_s12 = scalar_lea.sflag [#allocation5], %s1667_s7  ;;  %s1438_s26 = scalar_lea.vmem %s1722_s21, 2048 }
  0x3f   : > { %1221 = vmatprep.subr.bf16.mxu0 %v1361_v1  ;;  %1268 = vmatprep.subr.bf16.mxu1 %v1361_v1  ;;  %v1369_v5 = vld [vmem:[%s1673_s22 + $0x40] sm:$0xff]   ;;  %v1370_v10 = vld [vmem:[%s1673_s22 + $0x8] sm:$0xff]   ;;  %v1372_v12 = vld [vmem:[%s1673_s22 + $0x10] sm:$0xff]   ;;  %p1439_p1 = scmp.ne.s32.totalorder %s1722_s21, %s1438_s26  ;;  %s1528_s29 = smov [#allocation8]  }
  0x40   : > { %1235 = vmatprep.mubr.bf16.mxu0 %v1368_v4  ;;  %1251 = vmatprep.mubr.bf16.mxu1 %v1369_v5  ;;  %v1367_v9 = vld [vmem:[#allocation6] sm:$0xff]   ;;  %v1371_v11 = vld [vmem:[%s1673_s22 + $0x48] sm:$0xff]   ;;  %v1373_v13 = vld [vmem:[%s1673_s22 + $0x50] sm:$0xff]   ;;  %s1442_s18 = sshll.u32 %s1528_s29, 4  ;;  %s1443_s18 = int_to_ptr.vmem [resolvable:$false] %s1442_s18 }
  0x41   : > { %v1374_v14 = vld [vmem:[%s1673_s22 + $0x18] sm:$0xff]   ;;  %v1376_v16 = vld [vmem:[%s1673_s22 + $0x20] sm:$0xff]   ;;  %v1378_v18 = vld [vmem:[%s1673_s22 + $0x28] sm:$0xff]   ;;  %p1440_p8 = pnand %p1439_p1, %p1636_p13  ;;  %s1444_s30 = scalar_lea.vmem %s1443_s18, 4096 }
  0x42   : > { %1222 = vmatpush3.bf16.msra.mxu0 %v1361_v1  ;;  %1276 = vmatpush3.bf16.msra.mxu1 %v1361_v1  ;;  %v1375_v15 = vld [vmem:[%s1673_s22 + $0x58] sm:$0xff]   ;;  %v1377_v17 = vld [vmem:[%s1673_s22 + $0x60] sm:$0xff]   ;;  %v1379_v19 = vld [vmem:[%s1673_s22 + $0x68] sm:$0xff]   ;;  %p1445_p0 = scmp.lt.s32.totalorder %s1722_s21, %s1443_s18  ;;  %p1446_p2 = scmp.lt.s32.totalorder %s1444_s30, %s1438_s26 }
  0x43   : > { %1223 = vmatprep.subr.bf16.mxu0 %v1362_v2  ;;  %1269 = vmatprep.subr.bf16.mxu1 %v1362_v2  ;;  %v1380_v20 = vld [vmem:[%s1673_s22 + $0x30] sm:$0xff]   ;;  %v1382_v22 = vld [vmem:[%s1673_s22 + $0x38] sm:$0xff]   ;;  %p1441_p12 = pneg %p1440_p8 }
  0x44   : > { %v1381_v21 = vld [vmem:[%s1673_s22 + $0x70] sm:$0xff]   ;;  %v1383_v23 = vld [vmem:[%s1673_s22 + $0x78] sm:$0xff]   ;;  %p1447_p3 = por %p1446_p2, %p1445_p0 }
  0x46   : > { %1224 = vmatpush3.bf16.msra.mxu0 %v1362_v2  ;;  %1277 = vmatpush3.bf16.msra.mxu1 %v1362_v2  ;;  %p1448_p5 = pnand %p1447_p3, %p1441_p12 }
  0x47   : > { %1225 = vmatprep.subr.bf16.mxu0 %v1363_v3  ;;  %1270 = vmatprep.subr.bf16.mxu1 %v1363_v3 }
  0x4a   : > { %1226 = vmatpush3.bf16.msra.mxu0 %v1363_v3  ;;  %1278 = vmatpush3.bf16.msra.mxu1 %v1363_v3 }
  0x4b   : > { %1227 = vmatprep.subr.bf16.mxu0 %v1364_v6  ;;  %1271 = vmatprep.subr.bf16.mxu1 %v1364_v6 }
  0x4e   : > { %1228 = vmatpush3.bf16.msra.mxu0 %v1364_v6  ;;  %1279 = vmatpush3.bf16.msra.mxu1 %v1364_v6 }
  0x4f   : > { %1229 = vmatprep.subr.bf16.mxu0 %v1365_v7  ;;  %1272 = vmatprep.subr.bf16.mxu1 %v1365_v7 }
  0x52   : > { %1230 = vmatpush3.bf16.msra.mxu0 %v1365_v7  ;;  %1280 = vmatpush3.bf16.msra.mxu1 %v1365_v7 }
  0x53   : > { %1231 = vmatprep.subr.bf16.mxu0 %v1366_v8  ;;  %1273 = vmatprep.subr.bf16.mxu1 %v1366_v8 }
  0x56   : > { %1232 = vmatpush3.bf16.msra.mxu0 %v1366_v8  ;;  %1281 = vmatpush3.bf16.msra.mxu1 %v1366_v8 }
  0x57   : > { %1233 = vmatprep.subr.bf16.mxu0 %v1367_v9  ;;  %1274 = vmatprep.subr.bf16.mxu1 %v1367_v9 }
  0x5a   : > { %1234 = vmatpush3.bf16.msra.mxu0 %v1367_v9  ;;  %1282 = vmatpush3.bf16.msra.mxu1 %v1367_v9 }
  0x5d   : > { %1236 = vmatmul.mubr.bf16.vlgmr.msra.gmra.mxu0 %v1370_v10  ;;  %1252 = vmatmul.mubr.bf16.vlgmr.msra.gmra.mxu1 %v1371_v11 }
  0x5e   : > { %1239 = vmatprep.mubr.bf16.mxu0 %v1372_v12  ;;  %1255 = vmatprep.mubr.bf16.mxu1 %v1373_v13 }
  0x65   : > { %1240 = vmatmul.mubr.bf16.gmra.mxu0 %v1374_v14  ;;  %1256 = vmatmul.mubr.bf16.gmra.mxu1 %v1375_v15 }
  0x66   : > { %1243 = vmatprep.mubr.bf16.mxu0 %v1376_v16  ;;  %1259 = vmatprep.mubr.bf16.mxu1 %v1377_v17 }
  0x6d   : > { %1244 = vmatmul.mubr.bf16.gmra.mxu0 %v1378_v18  ;;  %1260 = vmatmul.mubr.bf16.gmra.mxu1 %v1379_v19 }
  0x6e   : > { %1247 = vmatprep.mubr.bf16.mxu0 %v1380_v20  ;;  %1263 = vmatprep.mubr.bf16.mxu1 %v1381_v21 }
  0x75   : > { %1248 = vmatmul.mubr.bf16.gmra.mxu0 %v1382_v22  ;;  %1264 = vmatmul.mubr.bf16.gmra.mxu1 %v1383_v23 }
 0x11d   : > { %v1237_v24 = vpop.f32.mrf.mxu0  ;;  %v1253_v25 = vpop.f32.mrf.mxu1 }
 0x11f   : > { %v498_v26 = vpop.f32.mrf.mxu0  ;;  %v562_v27 = vpop.f32.mrf.mxu1 }
 0x121   : > { %v1238_v28 = vpop.f32.mrf.mxu0  ;;  %v1254_v29 = vpop.f32.mrf.mxu1 }
 0x122   : > { %v1108_v30 = vpack.c.bf16 %v1238_v28, %v1237_v24  ;;  %v1148_v31 = vpack.c.bf16 %v1254_v29, %v1253_v25 }
 0x123   : > { %v501_v32 = vpop.f32.mrf.mxu0  ;;  %v565_v33 = vpop.f32.mrf.mxu1 }
 0x124   : > { %1180 = vst [vmem:[%s1701_s17 + $0x8] sm:$0xff] %v1108_v30   ;;  %1188 = vst [vmem:[%s1701_s17 + $0x48] sm:$0xff] %v1148_v31   ;;  %v1103_v34 = vpack.c.bf16 %v501_v32, %v498_v26  ;;  %v1143_v35 = vpack.c.bf16 %v565_v33, %v562_v27 }
 0x125   : > { %v1241_v36 = vpop.f32.mrf.mxu0  ;;  %v1257_v37 = vpop.f32.mrf.mxu1 }
 0x126   : > { %1104 = vst [vmem:[%s1701_s17] sm:$0xff] %v1103_v34   ;;  %1187 = vst [vmem:[%s1701_s17 + $0x40] sm:$0xff] %v1143_v35  }
 0x127   : > { %v514_v38 = vpop.f32.mrf.mxu0  ;;  %v578_v39 = vpop.f32.mrf.mxu1 }
 0x129   : > { %v1242_v40 = vpop.f32.mrf.mxu0  ;;  %v1258_v41 = vpop.f32.mrf.mxu1 }
 0x12a   : > { %v1118_v42 = vpack.c.bf16 %v1242_v40, %v1241_v36  ;;  %v1158_v43 = vpack.c.bf16 %v1258_v41, %v1257_v37 }
 0x12b   : > { %v517_v44 = vpop.f32.mrf.mxu0  ;;  %v581_v45 = vpop.f32.mrf.mxu1 }
 0x12c   : > { %1182 = vst [vmem:[%s1701_s17 + $0x18] sm:$0xff] %v1118_v42   ;;  %1190 = vst [vmem:[%s1701_s17 + $0x58] sm:$0xff] %v1158_v43   ;;  %v1113_v46 = vpack.c.bf16 %v517_v44, %v514_v38  ;;  %v1153_v47 = vpack.c.bf16 %v581_v45, %v578_v39 }
 0x12d   : > { %v1245_v48 = vpop.f32.mrf.mxu0  ;;  %v1261_v49 = vpop.f32.mrf.mxu1 }
 0x12e   : > { %1181 = vst [vmem:[%s1701_s17 + $0x10] sm:$0xff] %v1113_v46   ;;  %1189 = vst [vmem:[%s1701_s17 + $0x50] sm:$0xff] %v1153_v47  }
 0x12f   : > { %v530_v50 = vpop.f32.mrf.mxu0  ;;  %v594_v51 = vpop.f32.mrf.mxu1 }
 0x131   : > { %v1246_v52 = vpop.f32.mrf.mxu0  ;;  %v1262_v53 = vpop.f32.mrf.mxu1 }
 0x132   : > { %v1128_v54 = vpack.c.bf16 %v1246_v52, %v1245_v48  ;;  %v1168_v55 = vpack.c.bf16 %v1262_v53, %v1261_v49 }
 0x133   : > { %v533_v56 = vpop.f32.mrf.mxu0  ;;  %v597_v57 = vpop.f32.mrf.mxu1 }
 0x134   : > { %1184 = vst [vmem:[%s1701_s17 + $0x28] sm:$0xff] %v1128_v54   ;;  %1192 = vst [vmem:[%s1701_s17 + $0x68] sm:$0xff] %v1168_v55   ;;  %v1123_v58 = vpack.c.bf16 %v533_v56, %v530_v50  ;;  %v1163_v59 = vpack.c.bf16 %v597_v57, %v594_v51 }
 0x135   : > { %v1249_v60 = vpop.f32.mrf.mxu0  ;;  %v1265_v61 = vpop.f32.mrf.mxu1 }
 0x136   : > { %1183 = vst [vmem:[%s1701_s17 + $0x20] sm:$0xff] %v1123_v58   ;;  %1191 = vst [vmem:[%s1701_s17 + $0x60] sm:$0xff] %v1163_v59  }
 0x137   : > { %v546_v62 = vpop.f32.mrf.mxu0  ;;  %v610_v63 = vpop.f32.mrf.mxu1 }
 0x139   : > { %v1250_v0 = vpop.f32.mrf.mxu0  ;;  %v1266_v1 = vpop.f32.mrf.mxu1 }
 0x13a   : > { %v1138_v2 = vpack.c.bf16 %v1250_v0, %v1249_v60  ;;  %v1178_v3 = vpack.c.bf16 %v1266_v1, %v1265_v61 }
 0x13b   : > { %v549_v4 = vpop.f32.mrf.mxu0  ;;  %v613_v5 = vpop.f32.mrf.mxu1 }
 0x13c   : > { %1186 = vst [vmem:[%s1701_s17 + $0x38] sm:$0xff] %v1138_v2   ;;  %1194 = vst [vmem:[%s1701_s17 + $0x78] sm:$0xff] %v1178_v3   ;;  %v1133_v6 = vpack.c.bf16 %v549_v4, %v546_v62  ;;  %v1173_v7 = vpack.c.bf16 %v613_v5, %v610_v63 }
 0x13e   : > { %1185 = vst [vmem:[%s1701_s17 + $0x30] sm:$0xff] %v1133_v6   ;;  %1193 = vst [vmem:[%s1701_s17 + $0x70] sm:$0xff] %v1173_v7  }
 0x13f   : > { %1451 = shalt.err (!%p1448_p5)
}
 0x140   : > { %s1452_s6 = scalar_lea.hbm %s1720_s24, 2048  ;;  %s1456_s4 = scalar_lea.hbm %s1776_s2, 4096 }
 0x141   : > { %p1453_p7 = scmp.ne.s32.totalorder %s1720_s24, %s1452_s6  ;;  %p1457_p9 = scmp.lt.s32.totalorder %s1720_s24, %s1776_s2 }
 0x142   : > { %p1458_p11 = scmp.lt.s32.totalorder %s1456_s4, %s1452_s6 }
 0x143   : > { %p1454_p4 = pnand %p1453_p7, %p1636_p13 }
 0x144   : > { %p1459_p10 = por %p1458_p11, %p1457_p9 }
 0x145   : > { %p1455_p6 = pneg %p1454_p4 }
 0x147   : > { %p1460_p1 = pnand %p1459_p10, %p1455_p6 }
 0x149   : > { %1463 = shalt.err (!%p1460_p1)
}
 0x14a   : > { %s1529_s22 = smov 64   ;;  %s1530_s17 = smov 4  }
 0x14b   : > { %1289 = dma.vmem_to_hbm [thread:$0]  (%p1636_p13), %s1722_s21, 2048, %s1720_s24, %s885_s12, %s1529_s22, %s1529_s22, %s1530_s17  }
 0x14c PF: > { %s913_s19 = sand.u32 1, %s1502_s9   ;;  %p1790_p8 = scmp.ne.s32.totalorder %s1782_s20, 0 }
 0x14d   : > { %p1791_p12 = scmp.ge.s32.totalorder %s1522_s14, 2  ;;  %s914_s28 = scalar_lea.sflag [#allocation5], %s913_s19 }
 0x14f   : > { %p1300_p0 = pnand %p1791_p12, %p1790_p8 }
 0x151   : > { %p1301_p2 = pneg %p1300_p0 }
 0x153   : > { %1497 = dma.done.wait (%p1301_p2), %s914_s28, 2048  }
 0x154   : > { %1499 = vsyncadd (%p1301_p2), %s914_s28, 4294965248  ;;  %s19_s14 = sadd.s32 1, %s1522_s14   ;;  %s1792_s9 = smov %s1506_s10 }
 0x155   : > { %p16_p3 = scmp.ge.s32.totalorder %s19_s14, 4   ;;  %s1793_s10 = smov %s1510_s11 }
 0x156   : > { %s1794_s11 = smov %s1645_s15  ;;  %s1795_s12 = smov %s1518_s13 }
 0x157   : > { %s1796_s13 = smov %s1798_s25  ;;  %18 = sbr.rel (!%p16_p3) target bundleno = 7 (0x7), region = 86 }
 0x15c   :  { %919 = vsyncpa [#allocation4], 1 }
 0x15d   :  { %921 = vsyncpa [#allocation4 + $0x1], 1 }
 0x15e   :  { %922 = vsyncpa [#allocation7], 1 }
 0x15f   :  { %923 = vsyncpa [#allocation5], 1 }
 0x160   :  { %925 = vsyncpa [#allocation5 + $0x1], 1 }

</bundles_post_ra>
